<compile_context>
chip_gen: v5e
topology: v5e:2x2
jax: 0.10.0
libtpu: 0.0.40
codegen_flags: <defaults>
</compile_context>

<pallas_src>
from functools import partial

import numpy as np
import jax
import jax.numpy as jnp
from jax.experimental import pallas as pl
from jax.experimental.pallas import tpu as pltpu

NUM_RELATIONS = 8        # cfg.MODEL.NUM_RELATIONS
IMS_PER_BATCH = 2        # cfg.TRAIN.IMS_PER_BATCH
DIM_IN = 64              # dim_in of the module
HID_BILINEAR = 32        # nn.Linear(dim_in, 32)
REL_DIM_IN = 64          # 32 (sub) + 32 (obj)
REL_HID = 64             # nn.Linear(64, 64)
OUT_REL_DIM = NUM_RELATIONS
OUT_PAD = 128            # lane-dense padded logits width
NEG_INF = -1e30          # pad-lane bias so exp() of pad lanes == 0


def _round_up(v, m):
    return ((v + m - 1) // m) * m


def _padded_roi_count(n):
    # multiple of 16 so bf16 sublane packing is always clean
    return max(16, _round_up(n, 16))


def _choose_tile_p(total_pairs):
    # Bigger tiles amortize the ~0.35us/grid-step overhead, but keep >= 2 grid
    # steps when there is enough work so the "parallel" pair axis can shard
    # across v7x's 2 TensorCores.
    if total_pairs > 1024:
        return 512
    if total_pairs > 256:
        return 256
    return 128


# ---------------------------------------------------------------------------
# Stage 1 (runs once per forward): per-ROI projections.
#   sub = relu(x @ W_sub + b_sub); obj = relu(x @ W_obj + b_obj)
#   S1  = sub @ W1_top            ; O1  = obj @ W1_bot
# (relation_net layer 1 split by linearity: cat(sub,obj) @ W1 = sub@W1_top + obj@W1_bot)
# ---------------------------------------------------------------------------
def _proj_kernel(x_ref, ws_ref, bs_ref, wo_ref, bo_ref, w1t_ref, w1b_ref,
                 s1_ref, o1_ref):
    x = x_ref[...]                                                   # (n_pad, 64) bf16
    sub = jnp.maximum(
        jnp.dot(x, ws_ref[...], preferred_element_type=jnp.float32) + bs_ref[...], 0.0)
    obj = jnp.maximum(
        jnp.dot(x, wo_ref[...], preferred_element_type=jnp.float32) + bo_ref[...], 0.0)
    s1_ref[...] = jnp.dot(sub.astype(jnp.bfloat16), w1t_ref[...],
                          preferred_element_type=jnp.float32).astype(jnp.bfloat16)
    o1_ref[...] = jnp.dot(obj.astype(jnp.bfloat16), w1b_ref[...],
                          preferred_element_type=jnp.float32).astype(jnp.bfloat16)


# ---------------------------------------------------------------------------
# Stage 2 (tiled over pairs): fused one-hot gather + relation_net layer 2 +
# log_softmax.  pidx[:, 0] = row of S1 (subject), pidx[:, 1] = n_pad + row of O1
# (object); -1/-1 for padded pair rows (all-zero one-hot -> discarded rows).
# ---------------------------------------------------------------------------
def _pair_kernel(pidx_ref, so1_ref, b1_ref, w2_ref, b2_ref, out_ref):
    pidx = pidx_ref[...]                                  # (TILE_P, 2) int32
    tile_p = pidx.shape[0]
    n2 = so1_ref.shape[0]                                 # 2 * n_pad
    lane = jax.lax.broadcasted_iota(jnp.int32, (tile_p, n2), 1)
    # one-hot of {sub_row, obj_row} built directly in bf16 (0/1 exact in bf16)
    oh = jnp.logical_or(lane == pidx[:, 0:1],
                        lane == pidx[:, 1:2]).astype(jnp.bfloat16)   # (TILE_P, 2*n_pad)
    # single bf16 MXU gather: h1 = S1[sub] + O1[obj]
    h1 = jnp.dot(oh, so1_ref[...], preferred_element_type=jnp.float32)  # (TILE_P, 64)
    h = jnp.maximum(h1 + b1_ref[...], 0.0).astype(jnp.bfloat16)
    logits = jnp.dot(h, w2_ref[...],
                     preferred_element_type=jnp.float32) + b2_ref[...]  # (TILE_P, 128)
    m = jnp.max(logits, axis=-1, keepdims=True)
    z = logits - m
    lse = jnp.log(jnp.sum(jnp.exp(z), axis=-1, keepdims=True))
    out_ref[...] = (z - lse).astype(out_ref.dtype)


# ---------------------------------------------------------------------------
# Jitted device path (retraced per distinct (N, pair-count-bucket) shape).
# ---------------------------------------------------------------------------
@partial(jax.jit, static_argnames=("tile_p",))
def _device_forward(pidx, roi_feats, fp, *, tile_p):
    n = roi_feats.shape[0]
    n_pad = _padded_roi_count(n)
    tp_pad = pidx.shape[0]

    x = jnp.zeros((n_pad, DIM_IN), jnp.bfloat16).at[:n, :].set(
        roi_feats.astype(jnp.bfloat16))

    s1, o1 = pl.pallas_call(
        _proj_kernel,
        out_shape=(jax.ShapeDtypeStruct((n_pad, REL_HID), jnp.bfloat16),
                   jax.ShapeDtypeStruct((n_pad, REL_HID), jnp.bfloat16)),
        grid_spec=pltpu.PrefetchScalarGridSpec(
            num_scalar_prefetch=0,
            grid=(1,),
            in_specs=[
                pl.BlockSpec((n_pad, DIM_IN), lambda i: (0, 0)),            # x
                pl.BlockSpec((DIM_IN, HID_BILINEAR), lambda i: (0, 0)),     # W_sub
                pl.BlockSpec((1, HID_BILINEAR), lambda i: (0, 0)),          # b_sub
                pl.BlockSpec((DIM_IN, HID_BILINEAR), lambda i: (0, 0)),     # W_obj
                pl.BlockSpec((1, HID_BILINEAR), lambda i: (0, 0)),          # b_obj
                pl.BlockSpec((HID_BILINEAR, REL_HID), lambda i: (0, 0)),    # W1_top
                pl.BlockSpec((HID_BILINEAR, REL_HID), lambda i: (0, 0)),    # W1_bot
            ],
            out_specs=[pl.BlockSpec((n_pad, REL_HID), lambda i: (0, 0)),
                       pl.BlockSpec((n_pad, REL_HID), lambda i: (0, 0))],
        ),
        compiler_params=pltpu.CompilerParams(dimension_semantics=("arbitrary",)),
    )(x, fp["ws"], fp["bs"], fp["wo"], fp["bo"], fp["w1t"], fp["w1b"])

    # Stacked gather operand: rows [S1 ; O1]  -> (2*n_pad, 64) bf16 (tiny concat).
    so1 = jnp.concatenate([s1, o1], axis=0)

    out = pl.pallas_call(
        _pair_kernel,
        out_shape=jax.ShapeDtypeStruct((tp_pad, OUT_PAD), jnp.bfloat16),
        grid_spec=pltpu.PrefetchScalarGridSpec(
            num_scalar_prefetch=0,
            grid=(tp_pad // tile_p,),
            in_specs=[
                pl.BlockSpec((tile_p, 2), lambda i: (i, 0)),                # pair idx
                pl.BlockSpec((2 * n_pad, REL_HID), lambda i: (0, 0)),       # [S1;O1]
                pl.BlockSpec((1, REL_HID), lambda i: (0, 0)),               # b1
                pl.BlockSpec((REL_HID, OUT_PAD), lambda i: (0, 0)),         # W2 padded
                pl.BlockSpec((1, OUT_PAD), lambda i: (0, 0)),               # b2 padded
            ],
            out_specs=pl.BlockSpec((tile_p, OUT_PAD), lambda i: (i, 0)),
        ),
        compiler_params=pltpu.CompilerParams(
            dimension_semantics=("parallel",),
            vmem_limit_bytes=32 * 1024 * 1024,
        ),
    )(pidx, so1, fp["b1"], fp["w2p"], fp["b2p"])
    return out


# ---------------------------------------------------------------------------
# Host-side glue (mirrors the PyTorch per-image numpy bookkeeping)
# ---------------------------------------------------------------------------
def get_proposal_num(rois_np):
    return [int((rois_np[:, 0] == i).sum()) for i in range(IMS_PER_BATCH)]


def _build_pair_indices(proposal_num, n_pad, tile_p):
    subs, objs, head = [], [], 0
    for p in proposal_num:
        if p == 0:
            continue
        a = np.repeat(np.arange(p, dtype=np.int32), p) + head   # row-major (a, b) order
        b = np.tile(np.arange(p, dtype=np.int32), p) + head     # matches torch reshape
        subs.append(a)
        objs.append(b + n_pad)                                  # obj rows in bottom half
        head += p
    sub_all = np.concatenate(subs)
    obj_all = np.concatenate(objs)
    total_pairs = sub_all.shape[0]
    tp_pad = _round_up(total_pairs, tile_p)
    pidx = np.full((tp_pad, 2), -1, np.int32)                   # -1 -> all-zero one-hot
    pidx[:total_pairs, 0] = sub_all
    pidx[:total_pairs, 1] = obj_all
    return pidx


def prepare_folded_params(params):
    """Weight folding done ONCE at model-load time (hoisted out of per-call path)."""
    w1 = params["w1"]
    return {
        "ws": params["w_sub"].astype(jnp.bfloat16),
        "bs": params["b_sub"].astype(jnp.float32),
        "wo": params["w_obj"].astype(jnp.bfloat16),
        "bo": params["b_obj"].astype(jnp.float32),
        "w1t": w1[:HID_BILINEAR].astype(jnp.bfloat16),           # (32, 64)
        "w1b": w1[HID_BILINEAR:].astype(jnp.bfloat16),           # (32, 64)
        "b1": params["b1"].astype(jnp.float32),
        "w2p": (jnp.zeros((REL_HID, OUT_PAD), jnp.float32)
                .at[:, :OUT_REL_DIM].set(params["w2"]).astype(jnp.bfloat16)),
        "b2p": (jnp.full((1, OUT_PAD), NEG_INF, jnp.float32)
                .at[:, :OUT_REL_DIM].set(params["b2"])),
    }


def rel_outputs_forward(rois_np, roi_feats, folded_params):
    # NCHW (N, dim_in, 1, 1) -> (N, dim_in); reshape of unit dims is a no-op view.
    if roi_feats.ndim == 4:
        roi_feats = roi_feats.reshape(roi_feats.shape[0], roi_feats.shape[1])
    roi_feats = jax.lax.stop_gradient(roi_feats)  # RELATION_NET_FEAT_STOP_GRAG

    proposal_num = get_proposal_num(rois_np)      # host-side, same as PyTorch
    total_pairs = sum(p * p for p in proposal_num)
    if total_pairs == 0:                          # all-images-empty guard
        return jnp.zeros((0, OUT_REL_DIM), jnp.float32)

    n_pad = _padded_roi_count(roi_feats.shape[0])
    tile_p = _choose_tile_p(total_pairs)
    pidx = _build_pair_indices(proposal_num, n_pad, tile_p)

    out = _device_forward(jnp.asarray(pidx), roi_feats, folded_params, tile_p=tile_p)
    # Strip pair padding and lane padding -> (total_pairs, NUM_RELATIONS), f32.
    return out[:total_pairs, :OUT_REL_DIM].astype(jnp.float32)


# ---------------------------------------------------------------------------
# Pure-numpy f32 reference (replicates the PyTorch _forward, inference path)
# ---------------------------------------------------------------------------
def rel_outputs_reference(rois_np, roi_feats_np, params):
    x = np.asarray(roi_feats_np, np.float32).reshape(roi_feats_np.shape[0], DIM_IN)
    p_np = {k: np.asarray(v, np.float32) for k, v in params.items()}
    sub = np.maximum(x @ p_np["w_sub"] + p_np["b_sub"], 0.0)
    obj = np.maximum(x @ p_np["w_obj"] + p_np["b_obj"], 0.0)
    chunks, head = [], 0
    for p in get_proposal_num(rois_np):
        if p == 0:
            continue
        ts = np.broadcast_to(sub[head:head + p][:, None, :], (p, p, HID_BILINEAR))
        to = np.broadcast_to(obj[head:head + p][None, :, :], (p, p, HID_BILINEAR))
        chunks.append(np.concatenate([ts, to], axis=2).reshape(p * p, REL_DIM_IN))
        head += p
    rel = np.concatenate(chunks, axis=0)
    h = np.maximum(rel @ p_np["w1"] + p_np["b1"], 0.0)
    logits = h @ p_np["w2"] + p_np["b2"]
    z = logits - logits.max(axis=1, keepdims=True)
    return z - np.log(np.exp(z).sum(axis=1, keepdims=True))


# ---------------------------------------------------------------------------
# Deterministic parameter init (synthetic; shapes follow the module __init__)
# ---------------------------------------------------------------------------
def init_params(key):
    ks = jax.random.split(key, 8)
    sc = 0.05
    return {
        "w_sub": sc * jax.random.normal(ks[0], (DIM_IN, HID_BILINEAR), jnp.float32),
        "b_sub": sc * jax.random.normal(ks[1], (1, HID_BILINEAR), jnp.float32),
        "w_obj": sc * jax.random.normal(ks[2], (DIM_IN, HID_BILINEAR), jnp.float32),
        "b_obj": sc * jax.random.normal(ks[3], (1, HID_BILINEAR), jnp.float32),
        "w1":    sc * jax.random.normal(ks[4], (REL_DIM_IN, REL_HID), jnp.float32),
        "b1":    sc * jax.random.normal(ks[5], (1, REL_HID), jnp.float32),
        "w2":    sc * jax.random.normal(ks[6], (REL_HID, OUT_REL_DIM), jnp.float32),
        "b2":    sc * jax.random.normal(ks[7], (1, OUT_REL_DIM), jnp.float32),
    }


if __name__ == "__main__":
    key = jax.random.PRNGKey(0)
    k_feat1, k_feat2, k_param = jax.random.split(key, 3)

    params = init_params(k_param)
    folded = prepare_folded_params(params)   # one-time weight folding ("model load")

    def run_case(proposal_counts, k_feat):
        N = sum(proposal_counts)
        # rois: (N, 5), column 0 is the image index (host-side numpy, as in PyTorch)
        rois_np = np.zeros((N, 5), dtype=np.float32)
        head = 0
        for img, p in enumerate(proposal_counts):
            rois_np[head:head + p, 0] = img
            head += p
        rois_np[:, 1:] = np.arange(N * 4, dtype=np.float32).reshape(N, 4)

        # roi_feats: NCHW (N, dim_in, 1, 1) as produced by the RoI head
        roi_feats = jax.random.normal(k_feat, (N, DIM_IN, 1, 1), jnp.float32)

        logit_rel = rel_outputs_forward(rois_np, roi_feats, folded)
        logit_rel = jax.block_until_ready(logit_rel)

        total_pairs = sum(p * p for p in proposal_counts)
        assert logit_rel.shape == (total_pairs, OUT_REL_DIM), logit_rel.shape

        out_np = np.asarray(logit_rel, np.float32)
        # log_softmax rows must sum to ~1 in prob space (bf16 writeback -> loose tol)
        assert np.allclose(np.exp(out_np).sum(axis=1), 1.0, atol=1e-2)
        # match the f32 reference (bf16 MXU inputs + bf16 activations/writeback)
        ref = rel_outputs_reference(rois_np, np.asarray(roi_feats), params)
        err = float(np.abs(out_np - ref).max())
        assert err < 3e-2, err

    run_case([5, 3], k_feat1)      # single-tile path (grid = 1)
    run_case([13, 11], k_feat2)    # multi-tile path (grid = 2, "parallel" pair axis)

    print("KERNEL_OK")
</pallas_src>

<mosaic_0001>
module attributes {stable_mosaic.version = 11 : i64} {
  func.func @_proj_kernel(%arg0: i32, %arg1: memref<16x64xbf16, #tpu.memory_space<vmem>>, %arg2: memref<64x32xbf16, #tpu.memory_space<vmem>>, %arg3: memref<1x32xf32, #tpu.memory_space<vmem>>, %arg4: memref<64x32xbf16, #tpu.memory_space<vmem>>, %arg5: memref<1x32xf32, #tpu.memory_space<vmem>>, %arg6: memref<32x64xbf16, #tpu.memory_space<vmem>>, %arg7: memref<32x64xbf16, #tpu.memory_space<vmem>>, %arg8: memref<16x64xbf16, #tpu.memory_space<vmem>>, %arg9: memref<16x64xbf16, #tpu.memory_space<vmem>>) attributes {dimension_semantics = [#tpu.dimension_semantics<arbitrary>], iteration_bounds = array<i64: 1>, scalar_prefetch = 0 : i64, scratch_operands = 0 : i64, tpu.core_type = #tpu.core_type<tc>, window_params = [{pipeline_mode = #tpu.pipeline_mode<synchronous>, transform_indices = @transform_0, window_bounds = array<i64: 16, 64>}, {pipeline_mode = #tpu.pipeline_mode<synchronous>, transform_indices = @transform_1, window_bounds = array<i64: 64, 32>}, {pipeline_mode = #tpu.pipeline_mode<synchronous>, transform_indices = @transform_2, window_bounds = array<i64: 1, 32>}, {pipeline_mode = #tpu.pipeline_mode<synchronous>, transform_indices = @transform_3, window_bounds = array<i64: 64, 32>}, {pipeline_mode = #tpu.pipeline_mode<synchronous>, transform_indices = @transform_4, window_bounds = array<i64: 1, 32>}, {pipeline_mode = #tpu.pipeline_mode<synchronous>, transform_indices = @transform_5, window_bounds = array<i64: 32, 64>}, {pipeline_mode = #tpu.pipeline_mode<synchronous>, transform_indices = @transform_6, window_bounds = array<i64: 32, 64>}, {pipeline_mode = #tpu.pipeline_mode<synchronous>, transform_indices = @transform_7, window_bounds = array<i64: 16, 64>}, {pipeline_mode = #tpu.pipeline_mode<synchronous>, transform_indices = @transform_8, window_bounds = array<i64: 16, 64>}]} {
    %c0 = arith.constant 0 : index
    %c0_0 = arith.constant 0 : index
    %0 = vector.load %arg1[%c0, %c0_0] : memref<16x64xbf16, #tpu.memory_space<vmem>>, vector<16x64xbf16>
    %c0_1 = arith.constant 0 : index
    %c0_2 = arith.constant 0 : index
    %1 = vector.load %arg2[%c0_1, %c0_2] : memref<64x32xbf16, #tpu.memory_space<vmem>>, vector<64x32xbf16>
    %cst = arith.constant dense<0.000000e+00> : vector<16x32xf32>
    %2 = tpu.matmul %0, %1, %cst {dimension_numbers = #tpu.dot_dimension_numbers<[1], [0], [0], [1], [0, 0, 1, 1], [], []>} : vector<16x64xbf16>, vector<64x32xbf16>, vector<16x32xf32> -> vector<16x32xf32>
    %c0_3 = arith.constant 0 : index
    %c0_4 = arith.constant 0 : index
    %3 = vector.load %arg3[%c0_3, %c0_4] : memref<1x32xf32, #tpu.memory_space<vmem>>, vector<1x32xf32>
    %4 = vector.broadcast %3 : vector<1x32xf32> to vector<16x32xf32>
    %5 = arith.addf %2, %4 : vector<16x32xf32>
    %cst_5 = arith.constant 0.000000e+00 : f32
    %6 = vector.broadcast %cst_5 : f32 to vector<16x32xf32>
    %7 = arith.maximumf %5, %6 : vector<16x32xf32>
    %c0_6 = arith.constant 0 : index
    %c0_7 = arith.constant 0 : index
    %8 = vector.load %arg4[%c0_6, %c0_7] : memref<64x32xbf16, #tpu.memory_space<vmem>>, vector<64x32xbf16>
    %cst_8 = arith.constant dense<0.000000e+00> : vector<16x32xf32>
    %9 = tpu.matmul %0, %8, %cst_8 {dimension_numbers = #tpu.dot_dimension_numbers<[1], [0], [0], [1], [0, 0, 1, 1], [], []>} : vector<16x64xbf16>, vector<64x32xbf16>, vector<16x32xf32> -> vector<16x32xf32>
    %c0_9 = arith.constant 0 : index
    %c0_10 = arith.constant 0 : index
    %10 = vector.load %arg5[%c0_9, %c0_10] : memref<1x32xf32, #tpu.memory_space<vmem>>, vector<1x32xf32>
    %11 = vector.broadcast %10 : vector<1x32xf32> to vector<16x32xf32>
    %12 = arith.addf %9, %11 : vector<16x32xf32>
    %cst_11 = arith.constant 0.000000e+00 : f32
    %13 = vector.broadcast %cst_11 : f32 to vector<16x32xf32>
    %14 = arith.maximumf %12, %13 : vector<16x32xf32>
    %15 = arith.truncf %7 : vector<16x32xf32> to vector<16x32xbf16>
    %c0_12 = arith.constant 0 : index
    %c0_13 = arith.constant 0 : index
    %16 = vector.load %arg6[%c0_12, %c0_13] : memref<32x64xbf16, #tpu.memory_space<vmem>>, vector<32x64xbf16>
    %cst_14 = arith.constant dense<0.000000e+00> : vector<16x64xf32>
    %17 = tpu.matmul %15, %16, %cst_14 {dimension_numbers = #tpu.dot_dimension_numbers<[1], [0], [0], [1], [0, 0, 1, 1], [], []>} : vector<16x32xbf16>, vector<32x64xbf16>, vector<16x64xf32> -> vector<16x64xf32>
    %18 = arith.truncf %17 : vector<16x64xf32> to vector<16x64xbf16>
    %c0_15 = arith.constant 0 : index
    %c0_16 = arith.constant 0 : index
    %19 = vector.load %arg8[%c0_15, %c0_16] : memref<16x64xbf16, #tpu.memory_space<vmem>>, vector<16x64xbf16>
    tpu.vector_store %arg8[%c0_15, %c0_16], %18 {strides = array<i32>} : memref<16x64xbf16, #tpu.memory_space<vmem>>, vector<16x64xbf16>,
    %20 = arith.truncf %14 : vector<16x32xf32> to vector<16x32xbf16>
    %c0_17 = arith.constant 0 : index
    %c0_18 = arith.constant 0 : index
    %21 = vector.load %arg7[%c0_17, %c0_18] : memref<32x64xbf16, #tpu.memory_space<vmem>>, vector<32x64xbf16>
    %cst_19 = arith.constant dense<0.000000e+00> : vector<16x64xf32>
    %22 = tpu.matmul %20, %21, %cst_19 {dimension_numbers = #tpu.dot_dimension_numbers<[1], [0], [0], [1], [0, 0, 1, 1], [], []>} : vector<16x32xbf16>, vector<32x64xbf16>, vector<16x64xf32> -> vector<16x64xf32>
    %23 = arith.truncf %22 : vector<16x64xf32> to vector<16x64xbf16>
    %c0_20 = arith.constant 0 : index
    %c0_21 = arith.constant 0 : index
    %24 = vector.load %arg9[%c0_20, %c0_21] : memref<16x64xbf16, #tpu.memory_space<vmem>>, vector<16x64xbf16>
    tpu.vector_store %arg9[%c0_20, %c0_21], %23 {strides = array<i32>} : memref<16x64xbf16, #tpu.memory_space<vmem>>, vector<16x64xbf16>,
    return
  }
  func.func @transform_0(%arg0: i32) -> (i32, i32) {
    %c0_i32 = arith.constant 0 : i32
    %c0_i32_0 = arith.constant 0 : i32
    %c0_i32_1 = arith.constant 0 : i32
    return %c0_i32, %c0_i32_0 : i32, i32
  }
  func.func @transform_1(%arg0: i32) -> (i32, i32) {
    %c0_i32 = arith.constant 0 : i32
    %c0_i32_0 = arith.constant 0 : i32
    %c0_i32_1 = arith.constant 0 : i32
    return %c0_i32, %c0_i32_0 : i32, i32
  }
  func.func @transform_2(%arg0: i32) -> (i32, i32) {
    %c0_i32 = arith.constant 0 : i32
    %c0_i32_0 = arith.constant 0 : i32
    %c0_i32_1 = arith.constant 0 : i32
    return %c0_i32, %c0_i32_0 : i32, i32
  }
  func.func @transform_3(%arg0: i32) -> (i32, i32) {
    %c0_i32 = arith.constant 0 : i32
    %c0_i32_0 = arith.constant 0 : i32
    %c0_i32_1 = arith.constant 0 : i32
    return %c0_i32, %c0_i32_0 : i32, i32
  }
  func.func @transform_4(%arg0: i32) -> (i32, i32) {
    %c0_i32 = arith.constant 0 : i32
    %c0_i32_0 = arith.constant 0 : i32
    %c0_i32_1 = arith.constant 0 : i32
    return %c0_i32, %c0_i32_0 : i32, i32
  }
  func.func @transform_5(%arg0: i32) -> (i32, i32) {
    %c0_i32 = arith.constant 0 : i32
    %c0_i32_0 = arith.constant 0 : i32
    %c0_i32_1 = arith.constant 0 : i32
    return %c0_i32, %c0_i32_0 : i32, i32
  }
  func.func @transform_6(%arg0: i32) -> (i32, i32) {
    %c0_i32 = arith.constant 0 : i32
    %c0_i32_0 = arith.constant 0 : i32
    %c0_i32_1 = arith.constant 0 : i32
    return %c0_i32, %c0_i32_0 : i32, i32
  }
  func.func @transform_7(%arg0: i32) -> (i32, i32) {
    %c0_i32 = arith.constant 0 : i32
    %c0_i32_0 = arith.constant 0 : i32
    %c0_i32_1 = arith.constant 0 : i32
    return %c0_i32, %c0_i32_0 : i32, i32
  }
  func.func @transform_8(%arg0: i32) -> (i32, i32) {
    %c0_i32 = arith.constant 0 : i32
    %c0_i32_0 = arith.constant 0 : i32
    %c0_i32_1 = arith.constant 0 : i32
    return %c0_i32, %c0_i32_0 : i32, i32
  }
}

module attributes {stable_mosaic.version = 11 : i64} {
  func.func @_pair_kernel(%arg0: i32, %arg1: memref<128x2xi32, #tpu.memory_space<vmem>>, %arg2: memref<32x64xbf16, #tpu.memory_space<vmem>>, %arg3: memref<1x64xf32, #tpu.memory_space<vmem>>, %arg4: memref<64x128xbf16, #tpu.memory_space<vmem>>, %arg5: memref<1x128xf32, #tpu.memory_space<vmem>>, %arg6: memref<128x128xbf16, #tpu.memory_space<vmem>>) attributes {dimension_semantics = [#tpu.dimension_semantics<parallel>], iteration_bounds = array<i64: 1>, scalar_prefetch = 0 : i64, scratch_operands = 0 : i64, tpu.core_type = #tpu.core_type<tc>, window_params = [{transform_indices = @transform_0, window_bounds = array<i64: 128, 2>}, {pipeline_mode = #tpu.pipeline_mode<synchronous>, transform_indices = @transform_1, window_bounds = array<i64: 32, 64>}, {pipeline_mode = #tpu.pipeline_mode<synchronous>, transform_indices = @transform_2, window_bounds = array<i64: 1, 64>}, {pipeline_mode = #tpu.pipeline_mode<synchronous>, transform_indices = @transform_3, window_bounds = array<i64: 64, 128>}, {pipeline_mode = #tpu.pipeline_mode<synchronous>, transform_indices = @transform_4, window_bounds = array<i64: 1, 128>}, {transform_indices = @transform_5, window_bounds = array<i64: 128, 128>}]} {
    %c0 = arith.constant 0 : index
    %c0_0 = arith.constant 0 : index
    %0 = vector.load %arg1[%c0, %c0_0] : memref<128x2xi32, #tpu.memory_space<vmem>>, vector<128x2xi32>
    %1 = tpu.iota {dimensions = array<i32: 1>} : vector<128x32xi32>
    %2 = vector.extract_strided_slice %0 {offsets = [0, 0], sizes = [128, 1], strides = [1, 1]} : vector<128x2xi32> to vector<128x1xi32>
    %3 = vector.broadcast %2 : vector<128x1xi32> to vector<128x32xi32>
    %4 = arith.cmpi eq, %1, %3 : vector<128x32xi32>
    %5 = vector.extract_strided_slice %0 {offsets = [0, 1], sizes = [128, 1], strides = [1, 1]} : vector<128x2xi32> to vector<128x1xi32>
    %6 = vector.broadcast %5 : vector<128x1xi32> to vector<128x32xi32>
    %7 = arith.cmpi eq, %1, %6 : vector<128x32xi32>
    %8 = arith.ori %4, %7 : vector<128x32xi1>
    %9 = arith.extui %8 : vector<128x32xi1> to vector<128x32xi32>
    %10 = arith.sitofp %9 : vector<128x32xi32> to vector<128x32xf32>
    %11 = arith.truncf %10 : vector<128x32xf32> to vector<128x32xbf16>
    %c0_1 = arith.constant 0 : index
    %c0_2 = arith.constant 0 : index
    %12 = vector.load %arg2[%c0_1, %c0_2] : memref<32x64xbf16, #tpu.memory_space<vmem>>, vector<32x64xbf16>
    %cst = arith.constant dense<0.000000e+00> : vector<128x64xf32>
    %13 = tpu.matmul %11, %12, %cst {dimension_numbers = #tpu.dot_dimension_numbers<[1], [0], [0], [1], [0, 0, 1, 1], [], []>} : vector<128x32xbf16>, vector<32x64xbf16>, vector<128x64xf32> -> vector<128x64xf32>
    %c0_3 = arith.constant 0 : index
    %c0_4 = arith.constant 0 : index
    %14 = vector.load %arg3[%c0_3, %c0_4] : memref<1x64xf32, #tpu.memory_space<vmem>>, vector<1x64xf32>
    %15 = vector.broadcast %14 : vector<1x64xf32> to vector<128x64xf32>
    %16 = arith.addf %13, %15 : vector<128x64xf32>
    %cst_5 = arith.constant 0.000000e+00 : f32
    %17 = vector.broadcast %cst_5 : f32 to vector<128x64xf32>
    %18 = arith.maximumf %16, %17 : vector<128x64xf32>
    %19 = arith.truncf %18 : vector<128x64xf32> to vector<128x64xbf16>
    %c0_6 = arith.constant 0 : index
    %c0_7 = arith.constant 0 : index
    %20 = vector.load %arg4[%c0_6, %c0_7] : memref<64x128xbf16, #tpu.memory_space<vmem>>, vector<64x128xbf16>
    %cst_8 = arith.constant dense<0.000000e+00> : vector<128x128xf32>
    %21 = tpu.matmul %19, %20, %cst_8 {dimension_numbers = #tpu.dot_dimension_numbers<[1], [0], [0], [1], [0, 0, 1, 1], [], []>} : vector<128x64xbf16>, vector<64x128xbf16>, vector<128x128xf32> -> vector<128x128xf32>
    %c0_9 = arith.constant 0 : index
    %c0_10 = arith.constant 0 : index
    %22 = vector.load %arg5[%c0_9, %c0_10] : memref<1x128xf32, #tpu.memory_space<vmem>>, vector<1x128xf32>
    %23 = vector.broadcast %22 : vector<1x128xf32> to vector<128x128xf32>
    %24 = arith.addf %21, %23 : vector<128x128xf32>
    %cst_11 = arith.constant dense<0xFF800000> : vector<128xf32>
    %25 = vector.multi_reduction <maximumf>, %24, %cst_11 [1] : vector<128x128xf32> to vector<128xf32>
    %26 = vector.shape_cast %25 : vector<128xf32> to vector<128x1xf32>
    %27 = vector.broadcast %26 : vector<128x1xf32> to vector<128x128xf32>
    %28 = arith.subf %24, %27 : vector<128x128xf32>
    %29 = math.exp %28 : vector<128x128xf32>
    %cst_12 = arith.constant dense<0.000000e+00> : vector<128xf32>
    %30 = vector.multi_reduction <add>, %29, %cst_12 [1] : vector<128x128xf32> to vector<128xf32>
    %31 = vector.shape_cast %30 : vector<128xf32> to vector<128x1xf32>
    %32 = math.log %31 : vector<128x1xf32>
    %33 = vector.broadcast %32 : vector<128x1xf32> to vector<128x128xf32>
    %34 = arith.subf %28, %33 : vector<128x128xf32>
    %35 = arith.truncf %34 : vector<128x128xf32> to vector<128x128xbf16>
    %c0_13 = arith.constant 0 : index
    %c0_14 = arith.constant 0 : index
    %36 = vector.load %arg6[%c0_13, %c0_14] : memref<128x128xbf16, #tpu.memory_space<vmem>>, vector<128x128xbf16>
    tpu.vector_store %arg6[%c0_13, %c0_14], %35 {strides = array<i32>} : memref<128x128xbf16, #tpu.memory_space<vmem>>, vector<128x128xbf16>,
    return
  }
  func.func @transform_0(%arg0: i32) -> (i32, i32) {
    %c0_i32 = arith.constant 0 : i32
    %c0_i32_0 = arith.constant 0 : i32
    return %arg0, %c0_i32 : i32, i32
  }
  func.func @transform_1(%arg0: i32) -> (i32, i32) {
    %c0_i32 = arith.constant 0 : i32
    %c0_i32_0 = arith.constant 0 : i32
    %c0_i32_1 = arith.constant 0 : i32
    return %c0_i32, %c0_i32_0 : i32, i32
  }
  func.func @transform_2(%arg0: i32) -> (i32, i32) {
    %c0_i32 = arith.constant 0 : i32
    %c0_i32_0 = arith.constant 0 : i32
    %c0_i32_1 = arith.constant 0 : i32
    return %c0_i32, %c0_i32_0 : i32, i32
  }
  func.func @transform_3(%arg0: i32) -> (i32, i32) {
    %c0_i32 = arith.constant 0 : i32
    %c0_i32_0 = arith.constant 0 : i32
    %c0_i32_1 = arith.constant 0 : i32
    return %c0_i32, %c0_i32_0 : i32, i32
  }
  func.func @transform_4(%arg0: i32) -> (i32, i32) {
    %c0_i32 = arith.constant 0 : i32
    %c0_i32_0 = arith.constant 0 : i32
    %c0_i32_1 = arith.constant 0 : i32
    return %c0_i32, %c0_i32_0 : i32, i32
  }
  func.func @transform_5(%arg0: i32) -> (i32, i32) {
    %c0_i32 = arith.constant 0 : i32
    %c0_i32_0 = arith.constant 0 : i32
    return %arg0, %c0_i32 : i32, i32
  }
}

</mosaic_0001>

<bundles_post_ra>
// kernel: _device_forward.2
= control target key start
LH: loop header
LB: loop body
LE: loop exit
PB: predicated region body
PF: predicated region fallthrough
CT: control target
= control target key end

     0   :  { %vm72_vm0 = vcmask 523264   ;;  %vm161_vm1 = vcmask 261120   ;;  %vm181_vm2 = vcmask 519168   ;;  %s403_s1 = inlined_call_operand.vmem [shape: bf16[64,32], index: 1, kind: input, shape index: {}]   ;;  %s404_s3 = inlined_call_operand.vmem [shape: bf16[64,32], index: 3, kind: input, shape index: {}]   ;;  %s405_s2 = inlined_call_operand.vmem [shape: f32[1,32], index: 2, kind: input, shape index: {}]   ;;  %s406_s0 = inlined_call_operand.vmem [shape: bf16[16,64], index: 0, kind: input, shape index: {}]   ;;  %s407_s4 = inlined_call_operand.vmem [shape: f32[1,32], index: 4, kind: input, shape index: {}]   ;;  %s408_s5 = inlined_call_operand.vmem [shape: bf16[32,64], index: 5, kind: input, shape index: {}]   ;;  %s409_s6 = inlined_call_operand.vmem [shape: bf16[32,64], index: 6, kind: input, shape index: {}]   ;;  %s410_s7 = inlined_call_operand.vmem [shape: bf16[16,64], index: 7, kind: output, shape index: {0}]   ;;  %s411_s8 = inlined_call_operand.vmem [shape: bf16[16,64], index: 8, kind: output, shape index: {1}]  }
   0x1   :  { %v290_v0 = vld [vmem:[%s403_s1 + $0x18] sm:$0xff]  ;;  %v289_v2 = vld [vmem:[%s403_s1 + $0x10] sm:$0xff]  ;;  %v288_v4 = vld [vmem:[%s403_s1 + $0x8] sm:$0xff] }
   0x2   :  { %v294_v1 = vld [vmem:[%s404_s3 + $0x18] sm:$0xff]  ;;  %80 = vmatpush.bf16.msra.mxu0 %v290_v0  ;;  %v293_v3 = vld [vmem:[%s404_s3 + $0x10] sm:$0xff]  ;;  %v292_v5 = vld [vmem:[%s404_s3 + $0x8] sm:$0xff] }
   0x3   :  { %132 = vmatpush.bf16.msra.mxu1 %v294_v1  ;;  %v287_v6 = vld [vmem:[%s403_s1] sm:$0xff]  ;;  %v296_v9 = vld [vmem:[%s408_s5 + $0x8] sm:$0xff] }
   0x4   :  { %v291_v7 = vld [vmem:[%s404_s3] sm:$0xff]  ;;  %v298_v10 = vld [vmem:[%s409_s6 + $0x8] sm:$0xff]  ;;  %171 = vmatpush.bf16.msra.mxu2 %v296_v9 }
   0x5   :  { %v286_v8 = vld [vmem:[%s406_s0] sm:$0xff]  ;;  %210 = vmatpush.bf16.msra.mxu3 %v298_v10 }
   0x6   :  { %81 = vmatpush.bf16.msra.mxu0 %v289_v2  ;;  %v295_v11 = vld [vmem:[%s408_s5] sm:$0xff] }
   0x7   :  { %133 = vmatpush.bf16.msra.mxu1 %v293_v3  ;;  %v297_v12 = vld [vmem:[%s409_s6] sm:$0xff] }
   0x8   :  { %172 = vmatpush.bf16.msra.mxu2 %v295_v11  ;;  %v299_v15 = vld [vmem:[%s405_s2] ss:$0 sm:$0xff] }
   0x9   :  { %211 = vmatpush.bf16.msra.mxu3 %v297_v12  ;;  %v300_v16 = vld [vmem:[%s407_s4] ss:$0 sm:$0xff] }
   0xa   :  { %82 = vmatpush.bf16.msra.mxu0 %v288_v4 }
   0xb   :  { %134 = vmatpush.bf16.msra.mxu1 %v292_v5 }
   0xe   :  { %83 = vmatpush.bf16.msra.mxu0 %v287_v6 }
   0xf   :  { %135 = vmatpush.bf16.msra.mxu1 %v291_v7 }
  0x11   :  { %250 = vmatmul.msk.bf16.vlgmr.msra.gmra.mxu0 %vm72_vm0, %v286_v8 }
  0x12   :  { %267 = vmatmul.msk.bf16.vlgmr.msra.gmra.mxu1 %vm72_vm0, %v286_v8 }
  0x8e   :  { %v85_v13 = vpop.f32.mrf.mxu0 }
  0x8f   :  { %v137_v14 = vpop.f32.mrf.mxu1  ;;  %v86_v17 = vadd.f32 %v299_v15, %v85_v13 }
  0x90   :  { %v138_v18 = vadd.f32 %v300_v16, %v137_v14 }
  0x91   :  { %v90_v23 = vmax.f32 %v86_v17, 0.0 }
  0x92   :  { %v142_v24 = vmax.f32 %v138_v18, 0.0 }
  0x96   :  { %v87_v19 = vpop.f32.mrf.mxu0 }
  0x97   :  { %v139_v20 = vpop.f32.mrf.mxu1  ;;  %v88_v21 = vadd.f32 %v299_v15, %v87_v19 }
  0x98   :  { %v140_v22 = vadd.f32 %v300_v16, %v139_v20 }
  0x99   :  { %v91_v25 = vmax.f32 %v88_v21, 0.0 }
  0x9a   :  { %v143_v26 = vmax.f32 %v140_v22, 0.0 }
  0x9b   :  { %v144_v27 = vpack.c.bf16 %v91_v25, %v90_v23 }
  0x9c   :  { %v184_v28 = vpack.c.bf16 %v143_v26, %v142_v24 }
  0x9d   :  { %276 = vmatmul.msk.bf16.vlgmr.msra.gmra.mxu2 %vm161_vm1, %v144_v27 }
  0x9e   :  { %285 = vmatmul.msk.bf16.vlgmr.msra.gmra.mxu3 %vm161_vm1, %v184_v28 }
 0x120   :  { %v174_v29 = vpop.f32.mrf.mxu2 }
 0x121   :  { %v213_v30 = vpop.f32.mrf.mxu3  ;;  %v179_v31 = vpack.c.bf16 %v174_v29, %v174_v29 }
 0x122   :  { %v218_v32 = vpack.c.bf16 %v213_v30, %v213_v30 }
 0x123   :  { %182 = vst.msk [vmem:[%s410_s7] sm:$0xf] %vm181_vm2, %v179_v31 }
 0x124   :  { %220 = vst.msk [vmem:[%s411_s8] sm:$0xf] %vm181_vm2, %v218_v32 }
 0x128   :  { %v176_v33 = vpop.f32.mrf.mxu2 }
 0x129   :  { %v215_v34 = vpop.f32.mrf.mxu3  ;;  %v180_v35 = vpack.c.bf16 %v176_v33, %v176_v33 }
 0x12a   :  { %v219_v36 = vpack.c.bf16 %v215_v34, %v215_v34 }
 0x12b   :  { %183 = vst.msk [vmem:[%s410_s7 + $0x4] sm:$0xf] %vm181_vm2, %v180_v35 }
 0x12c   :  { %221 = vst.msk [vmem:[%s411_s8 + $0x4] sm:$0xf] %vm181_vm2, %v219_v36 }

// kernel: _device_forward.3
= control target key start
LH: loop header
LB: loop body
LE: loop exit
PB: predicated region body
PF: predicated region fallthrough
CT: control target
= control target key end

     0   :  { %v893_v1 = vmov 1   ;;  %v894_v2 = vmov 0   ;;  %s1183_s0 = inlined_call_operand.vmem [shape: s32[128,2], index: 0, kind: input, shape index: {}]   ;;  %s1184_s1 = inlined_call_operand.vmem [shape: bf16[32,64], index: 1, kind: input, shape index: {}]   ;;  %s1185_s2 = inlined_call_operand.vmem [shape: f32[1,64], index: 2, kind: input, shape index: {}]   ;;  %s1186_s3 = inlined_call_operand.vmem [shape: bf16[64,128], index: 3, kind: input, shape index: {}]   ;;  %s1187_s4 = inlined_call_operand.vmem [shape: f32[1,128], index: 4, kind: input, shape index: {}]   ;;  %s1188_s5 = inlined_call_operand.hbm [shape: bf16[128,128], index: 5, kind: output, shape index: {}]  }
   0x1   :  { %v22_v0 = vld [vmem:[%s1183_s0] sm:$0xff]  ;;  %784 = vset.pattern.permute.xlu1 %v893_v1  ;;  %783 = vset.pattern.permute.xlu0 %v894_v2  ;;  %v24_v3 = vld [vmem:[%s1183_s0 + $0x10] sm:$0xff] }
   0x2   :  { %105 = vperm.xlu1 %784, %v22_v0   ;;  %41 = vperm.xlu0 %783, %v22_v0  }
   0x3   :  { %785 = vset.pattern.permute.xlu2 %v894_v2 }
   0x4   :  { %10 = vsyncpa [#allocation3], 0  ;;  %47 = vperm.xlu2 %785, %v24_v3   ;;  %v23_v4 = vld [vmem:[%s1183_s0 + $0x8] sm:$0xff]  ;;  %v25_v5 = vld [vmem:[%s1183_s0 + $0x18] sm:$0xff]  ;;  %v38_v21 = vlaneseq  ;;  %v895_v29 = vmov 0.0   ;;  %vm244_vm6 = vcmask 261120  }
   0x5   :  { %v26_v6 = vld [vmem:[%s1183_s0 + $0x20] sm:$0xff]  ;;  %v27_v7 = vld [vmem:[%s1183_s0 + $0x28] sm:$0xff]  ;;  %v28_v8 = vld [vmem:[%s1183_s0 + $0x30] sm:$0xff]  ;;  %s650_s15 = sshll.u32 %s1188_s5, 4  ;;  %s897_s16 = smov 64   ;;  %s651_s15 = int_to_ptr.hbm [resolvable:$true] %s650_s15 }
   0x6   :  { %v29_v9 = vld [vmem:[%s1183_s0 + $0x38] sm:$0xff]  ;;  %v31_v10 = vld [vmem:[%s1183_s0 + $0x48] sm:$0xff]  ;;  %v30_v11 = vld [vmem:[%s1183_s0 + $0x40] sm:$0xff]  ;;  %v992_v25 = vand.u32 127, %v38_v21  ;;  %s898_s17 = smov 4  }
   0x7   :  { %v32_v12 = vld [vmem:[%s1183_s0 + $0x50] sm:$0xff]  ;;  %v35_v13 = vld [vmem:[%s1183_s0 + $0x68] sm:$0xff]  ;;  %v33_v14 = vld [vmem:[%s1183_s0 + $0x58] sm:$0xff] }
   0x8   :  { %v36_v15 = vld [vmem:[%s1183_s0 + $0x70] sm:$0xff]  ;;  %v34_v16 = vld [vmem:[%s1183_s0 + $0x60] sm:$0xff]  ;;  %v719_v17 = vld [vmem:[%s1184_s1 + $0x8] sm:$0xff] }
   0x9   :  { %v37_v18 = vld [vmem:[%s1183_s0 + $0x78] sm:$0xff]  ;;  %275 = vmatpush.bf16.msra.mxu0 %v719_v17  ;;  %771 = vmatpush.bf16.msra.mxu3 %v719_v17  ;;  %v718_v19 = vld [vmem:[%s1184_s1] sm:$0xff]  ;;  %v721_v17 = vld [vmem:[%s1186_s3 + $0x8] sm:$0xff] }
   0xa   :  { %108 = vperm.xlu1 %784, %v23_v4   ;;  %44 = vperm.xlu0 %783, %v23_v4  }
   0xc   :  { %50 = vperm.xlu2 %785, %v25_v5  }
   0xd   :  { %276 = vmatpush.bf16.msra.mxu0 %v718_v19  ;;  %772 = vmatpush.bf16.msra.mxu3 %v718_v19 }
  0x12   :  { %114 = vperm.xlu1 %784, %v25_v5   ;;  %786 = vset.pattern.permute.xlu0 %v893_v1 }
  0x13   :  { %111 = vperm.xlu0 %786, %v24_v3  }
  0x14   :  { %53 = vperm.xlu2 %785, %v26_v6  }
  0x1a   :  { %787 = vset.pattern.permute.xlu1 %v894_v2 }
  0x1b   :  { %56 = vperm.xlu1 %787, %v27_v7   ;;  %120 = vperm.xlu0 %786, %v27_v7  }
  0x1c   :  { %788 = vset.pattern.permute.xlu2 %v893_v1 }
  0x1d   :  { %117 = vperm.xlu2 %788, %v26_v6  }
  0x23   :  { %59 = vperm.xlu1 %787, %v28_v8   ;;  %123 = vperm.xlu0 %786, %v28_v8  }
  0x25   :  { %789 = vset.pattern.permute.xlu2 %v894_v2 }
  0x26   :  { %62 = vperm.xlu2 %789, %v29_v9  }
  0x2b   :  { %790 = vset.pattern.permute.xlu1 %v893_v1  ;;  %791 = vset.pattern.permute.xlu0 %v894_v2 }
  0x2c   :  { %126 = vperm.xlu1 %790, %v29_v9   ;;  %68 = vperm.xlu0 %791, %v31_v10  }
  0x2e   :  { %65 = vperm.xlu2 %789, %v30_v11  }
  0x34   :  { %129 = vperm.xlu1 %790, %v30_v11   ;;  %795 = vset.pattern.permute.xlu0 %v893_v1 }
  0x35   :  { %135 = vperm.xlu0 %795, %v32_v12  }
  0x36   :  { %792 = vset.pattern.permute.xlu2 %v893_v1 }
  0x37   :  { %132 = vperm.xlu2 %792, %v31_v10  }
  0x3c   :  { %793 = vset.pattern.permute.xlu1 %v894_v2 }
  0x3d   :  { %71 = vperm.xlu1 %793, %v32_v12   ;;  %144 = vperm.xlu0 %795, %v35_v13  }
  0x3f   :  { %794 = vset.pattern.permute.xlu2 %v894_v2 }
  0x40   :  { %74 = vperm.xlu2 %794, %v33_v14  }
  0x45   :  { %796 = vset.pattern.permute.xlu1 %v893_v1  ;;  %147 = vperm.xlu0 %795, %v36_v15  }
  0x46   :  { %138 = vperm.xlu1 %796, %v33_v14  }
  0x48   :  { %77 = vperm.xlu2 %794, %v34_v16  }
  0x4e   :  { %797 = vset.pattern.permute.xlu1 %v894_v2 }
  0x4f   :  { %80 = vperm.xlu1 %797, %v35_v13  }
  0x50   :  { %798 = vset.pattern.permute.xlu2 %v893_v1 }
  0x51   :  { %141 = vperm.xlu2 %798, %v34_v16   ;;  %v722_v16 = vld [vmem:[%s1186_s3 + $0x10] sm:$0xff] }
  0x57   :  { %83 = vperm.xlu1 %797, %v36_v15   ;;  %v723_v15 = vld [vmem:[%s1186_s3 + $0x18] sm:$0xff] }
  0x58   :  { %407 = vmatpush.bf16.msra.mxu1 %v723_v15  ;;  %773 = vmatpush.bf16.msra.mxu2 %v723_v15 }
  0x59   :  { %799 = vset.pattern.permute.xlu2 %v894_v2 }
  0x5a   :  { %86 = vperm.xlu2 %799, %v37_v18  }
  0x5c   :  { %408 = vmatpush.bf16.msra.mxu1 %v722_v16  ;;  %774 = vmatpush.bf16.msra.mxu2 %v722_v16 }
  0x5e   :  { %v48_v20 = vpop.permute.xlu2 %47 }
  0x5f   :  { %800 = vset.pattern.permute.xlu1 %v893_v1  ;;  %vm90_vm10 = vcmp.eq.s32.totalorder %v992_v25, %v48_v20  ;;  %v801_v20 = vld [vmem:[%s1185_s2] ss:$0 sm:$0xff] }
  0x60   :  { %150 = vperm.xlu1 %800, %v37_v18   ;;  %409 = vmatpush.bf16.msra.mxu1 %v721_v17  ;;  %v720_v18 = vld [vmem:[%s1186_s3] sm:$0xff] }
  0x61   :  { %775 = vmatpush.bf16.msra.mxu2 %v721_v17 }
  0x64   :  { %410 = vmatpush.bf16.msra.mxu1 %v720_v18 }
  0x65   :  { %776 = vmatpush.bf16.msra.mxu2 %v720_v18 }
  0x66   :  { %v51_v22 = vpop.permute.xlu2 %50 }
  0x67   :  { %vm91_vm7 = vcmp.eq.s32.totalorder %v992_v25, %v51_v22 }
  0x6e   :  { %v54_v28 = vpop.permute.xlu2 %53 }
  0x6f   :  { %vm92_vm15 = vcmp.eq.s32.totalorder %v992_v25, %v54_v28 }
  0x74   :  { %v106_v23 = vpop.permute.xlu1 %105  ;;  %v42_v24 = vpop.permute.xlu0 %41 }
  0x75   :  { %vm152_vm0 = vcmp.eq.s32.totalorder %v992_v25, %v106_v23  ;;  %vm88_vm1 = vcmp.eq.s32.totalorder %v992_v25, %v42_v24 }
  0x76   :  { %vm168_vm2 = vmor %vm88_vm1, %vm152_vm0 }
  0x77   :  { %v662_v30 = vsel %vm168_vm2, 1.0, %v895_v29  ;;  %v118_v35 = vpop.permute.xlu2 %117 }
  0x78   :  { %vm156_vm0 = vcmp.eq.s32.totalorder %v992_v25, %v118_v35 }
  0x79   :  { %vm172_vm2 = vmor %vm92_vm15, %vm156_vm0 }
  0x7a   :  { %v666_v46 = vsel %vm172_vm2, 1.0, %v895_v29 }
  0x7c   :  { %v109_v26 = vpop.permute.xlu1 %108  ;;  %v45_v27 = vpop.permute.xlu0 %44 }
  0x7d   :  { %vm153_vm3 = vcmp.eq.s32.totalorder %v992_v25, %v109_v26  ;;  %vm89_vm4 = vcmp.eq.s32.totalorder %v992_v25, %v45_v27 }
  0x7e   :  { %vm169_vm5 = vmor %vm89_vm4, %vm153_vm3 }
  0x7f   :  { %v663_v31 = vsel %vm169_vm5, 1.0, %v895_v29 }
  0x80   :  { %v216_v32 = vpack.c.bf16 %v663_v31, %v662_v30  ;;  %v63_v39 = vpop.permute.xlu2 %62 }
  0x81   :  { %vm95_vm3 = vcmp.eq.s32.totalorder %v992_v25, %v63_v39 }
  0x82   :  { %686 = vmatmul.msk.bf16.vlgmr.msra.gmra.mxu0 %vm244_vm6, %v216_v32 }
  0x84   :  { %v115_v33 = vpop.permute.xlu1 %114 }
  0x85   :  { %v112_v34 = vpop.permute.xlu0 %111  ;;  %vm155_vm8 = vcmp.eq.s32.totalorder %v992_v25, %v115_v33 }
  0x86   :  { %vm154_vm9 = vcmp.eq.s32.totalorder %v992_v25, %v112_v34  ;;  %vm171_vm11 = vmor %vm91_vm7, %vm155_vm8 }
  0x87   :  { %vm170_vm12 = vmor %vm90_vm10, %vm154_vm9  ;;  %v665_v36 = vsel %vm171_vm11, 1.0, %v895_v29 }
  0x88   :  { %v664_v37 = vsel %vm170_vm12, 1.0, %v895_v29  ;;  %v66_v43 = vpop.permute.xlu2 %65 }
  0x89   :  { %v217_v40 = vpack.c.bf16 %v665_v36, %v664_v37 }
  0x8d   :  { %v57_v38 = vpop.permute.xlu1 %56  ;;  %v121_v41 = vpop.permute.xlu0 %120 }
  0x8e   :  { %vm93_vm13 = vcmp.eq.s32.totalorder %v992_v25, %v57_v38  ;;  %vm157_vm14 = vcmp.eq.s32.totalorder %v992_v25, %v121_v41 }
  0x8f   :  { %vm173_vm1 = vmor %vm93_vm13, %vm157_vm14  ;;  %vm96_vm14 = vcmp.eq.s32.totalorder %v992_v25, %v66_v43 }
  0x90   :  { %v667_v44 = vsel %vm173_vm1, 1.0, %v895_v29 }
  0x91   :  { %v218_v47 = vpack.c.bf16 %v667_v44, %v666_v46  ;;  %v133_v49 = vpop.permute.xlu2 %132 }
  0x92   :  { %687 = vmatmul.msk.bf16.gmra.mxu0 %vm244_vm6, %v217_v40  ;;  %vm161_vm12 = vcmp.eq.s32.totalorder %v992_v25, %v133_v49 }
  0x95   :  { %v60_v42 = vpop.permute.xlu1 %59  ;;  %v124_v48 = vpop.permute.xlu0 %123 }
  0x96   :  { %vm94_vm5 = vcmp.eq.s32.totalorder %v992_v25, %v60_v42  ;;  %vm158_vm7 = vcmp.eq.s32.totalorder %v992_v25, %v124_v48 }
  0x97   :  { %vm174_vm9 = vmor %vm94_vm5, %vm158_vm7 }
  0x98   :  { %v668_v54 = vsel %vm174_vm9, 1.0, %v895_v29 }
  0x9a   :  { %v75_v52 = vpop.permute.xlu2 %74 }
  0x9b   :  { %vm99_vm1 = vcmp.eq.s32.totalorder %v992_v25, %v75_v52 }
  0x9e   :  { %v127_v45 = vpop.permute.xlu1 %126  ;;  %v69_v51 = vpop.permute.xlu0 %68 }
  0x9f   :  { %vm159_vm4 = vcmp.eq.s32.totalorder %v992_v25, %v127_v45  ;;  %vm97_vm13 = vcmp.eq.s32.totalorder %v992_v25, %v69_v51 }
  0xa0   :  { %vm175_vm8 = vmor %vm95_vm3, %vm159_vm4 }
  0xa1   :  { %v669_v53 = vsel %vm175_vm8, 1.0, %v895_v29  ;;  %vm177_vm2 = vmor %vm97_vm13, %vm161_vm12 }
  0xa2   :  { %688 = vmatmul.msk.bf16.gmra.mxu0 %vm244_vm6, %v218_v47  ;;  %v219_v56 = vpack.c.bf16 %v669_v53, %v668_v54  ;;  %v78_v58 = vpop.permute.xlu2 %77  ;;  %v671_v0 = vsel %vm177_vm2, 1.0, %v895_v29 }
  0xa3   :  { %vm100_vm7 = vcmp.eq.s32.totalorder %v992_v25, %v78_v58 }
  0xa6   :  { %v130_v50 = vpop.permute.xlu1 %129 }
  0xa7   :  { %v136_v57 = vpop.permute.xlu0 %135  ;;  %vm160_vm15 = vcmp.eq.s32.totalorder %v992_v25, %v130_v50 }
  0xa8   :  { %vm162_vm11 = vcmp.eq.s32.totalorder %v992_v25, %v136_v57  ;;  %vm176_vm3 = vmor %vm96_vm14, %vm160_vm15 }
  0xa9   :  { %v670_v63 = vsel %vm176_vm3, 1.0, %v895_v29 }
  0xaa   :  { %v220_v2 = vpack.c.bf16 %v671_v0, %v670_v63 }
  0xab   :  { %v142_v1 = vpop.permute.xlu2 %141 }
  0xac   :  { %vm164_vm8 = vcmp.eq.s32.totalorder %v992_v25, %v142_v1 }
  0xaf   :  { %v72_v55 = vpop.permute.xlu1 %71  ;;  %v145_v4 = vpop.permute.xlu0 %144 }
  0xb0   :  { %vm98_vm10 = vcmp.eq.s32.totalorder %v992_v25, %v72_v55  ;;  %vm165_vm9 = vcmp.eq.s32.totalorder %v992_v25, %v145_v4 }
  0xb1   :  { %vm178_vm0 = vmor %vm98_vm10, %vm162_vm11 }
  0xb2   :  { %689 = vmatmul.msk.bf16.gmra.mxu0 %vm244_vm6, %v219_v56  ;;  %v672_v60 = vsel %vm178_vm0, 1.0, %v895_v29  ;;  %vm180_vm11 = vmor %vm100_vm7, %vm164_vm8 }
  0xb3   :  { %v674_v6 = vsel %vm180_vm11, 1.0, %v895_v29 }
  0xb4   :  { %v87_v9 = vpop.permute.xlu2 %86 }
  0xb5   :  { %vm103_vm13 = vcmp.eq.s32.totalorder %v992_v25, %v87_v9 }
  0xb7   :  { %v148_v11 = vpop.permute.xlu0 %147 }
  0xb8   :  { %v139_v59 = vpop.permute.xlu1 %138 }
  0xb9   :  { %vm163_vm4 = vcmp.eq.s32.totalorder %v992_v25, %v139_v59 }
  0xba   :  { %vm179_vm5 = vmor %vm99_vm1, %vm163_vm4  ;;  %vm166_vm1 = vcmp.eq.s32.totalorder %v992_v25, %v148_v11 }
  0xbb   :  { %v673_v61 = vsel %vm179_vm5, 1.0, %v895_v29 }
  0xbc   :  { %v221_v62 = vpack.c.bf16 %v673_v61, %v672_v60 }
  0xbe   :  { %691 = vmatmul.msk.bf16.vlgmr.msra.gmra.mxu3 %vm244_vm6, %v221_v62 }
  0xc1   :  { %v81_v3 = vpop.permute.xlu1 %80 }
  0xc2   :  { %690 = vmatmul.msk.bf16.gmra.mxu0 %vm244_vm6, %v220_v2  ;;  %vm101_vm10 = vcmp.eq.s32.totalorder %v992_v25, %v81_v3 }
  0xc3   :  { %vm181_vm12 = vmor %vm101_vm10, %vm165_vm9 }
  0xc4   :  { %v675_v5 = vsel %vm181_vm12, 1.0, %v895_v29 }
  0xc5   :  { %v222_v8 = vpack.c.bf16 %v675_v5, %v674_v6 }
  0xc9   :  { %v84_v7 = vpop.permute.xlu1 %83 }
  0xca   :  { %vm102_vm15 = vcmp.eq.s32.totalorder %v992_v25, %v84_v7 }
  0xcb   :  { %vm182_vm2 = vmor %vm102_vm15, %vm166_vm1 }
  0xcc   :  { %v676_v13 = vsel %vm182_vm2, 1.0, %v895_v29 }
  0xce   :  { %692 = vmatmul.msk.bf16.gmra.mxu3 %vm244_vm6, %v222_v8 }
  0xd2   :  { %v151_v10 = vpop.permute.xlu1 %150 }
  0xd3   :  { %vm167_vm14 = vcmp.eq.s32.totalorder %v992_v25, %v151_v10 }
  0xd4   :  { %vm183_vm0 = vmor %vm103_vm13, %vm167_vm14 }
  0xd5   :  { %v677_v12 = vsel %vm183_vm0, 1.0, %v895_v29 }
  0xd6   :  { %v223_v14 = vpack.c.bf16 %v677_v12, %v676_v13  ;;  %v802_v12 = vld [vmem:[%s1187_s4] ss:$0 sm:$0xff]  ;;  %s896_s4 = smov [#allocation2]  }
  0xd7   :  { %s648_s12 = sshll.u32 %s896_s4, 4  ;;  %s649_s12 = int_to_ptr.vmem [resolvable:$true] %s648_s12 }
  0xde   :  { %693 = vmatmul.msk.bf16.gmra.mxu3 %vm244_vm6, %v223_v14  ;;  %vm378_vm6 = vcmask 523264  }
  0xff   :  { %v278_v19 = vpop.f32.mrf.mxu0 }
 0x100   :  { %v279_v21 = vadd.f32 %v801_v20, %v278_v19 }
 0x102   :  { %v318_v24 = vmax.f32 %v279_v21, 0.0 }
 0x107   :  { %v280_v22 = vpop.f32.mrf.mxu0 }
 0x108   :  { %v281_v23 = vadd.f32 %v801_v20, %v280_v22 }
 0x10a   :  { %v319_v25 = vmax.f32 %v281_v23, 0.0 }
 0x10c   :  { %v334_v26 = vpack.c.bf16 %v319_v25, %v318_v24 }
 0x10e   :  { %710 = vmatmul.msk.bf16.vlgmr.msra.gmra.mxu1 %vm378_vm6, %v334_v26 }
 0x10f   :  { %v283_v27 = vpop.f32.mrf.mxu0 }
 0x110   :  { %v284_v28 = vadd.f32 %v801_v20, %v283_v27 }
 0x112   :  { %v320_v31 = vmax.f32 %v284_v28, 0.0 }
 0x117   :  { %v285_v29 = vpop.f32.mrf.mxu0 }
 0x118   :  { %v286_v30 = vadd.f32 %v801_v20, %v285_v29 }
 0x11a   :  { %v321_v32 = vmax.f32 %v286_v30, 0.0 }
 0x11c   :  { %v335_v33 = vpack.c.bf16 %v321_v32, %v320_v31 }
 0x11e   :  { %711 = vmatmul.msk.bf16.gmra.mxu1 %vm378_vm6, %v335_v33 }
 0x11f   :  { %v288_v34 = vpop.f32.mrf.mxu0 }
 0x120   :  { %v289_v35 = vadd.f32 %v801_v20, %v288_v34 }
 0x122   :  { %v322_v38 = vmax.f32 %v289_v35, 0.0 }
 0x127   :  { %v290_v36 = vpop.f32.mrf.mxu0 }
 0x128   :  { %v291_v37 = vadd.f32 %v801_v20, %v290_v36 }
 0x12a   :  { %v323_v39 = vmax.f32 %v291_v37, 0.0 }
 0x12c   :  { %v336_v40 = vpack.c.bf16 %v323_v39, %v322_v38 }
 0x12e   :  { %712 = vmatmul.msk.bf16.gmra.mxu1 %vm378_vm6, %v336_v40 }
 0x12f   :  { %v293_v41 = vpop.f32.mrf.mxu0 }
 0x130   :  { %v294_v42 = vadd.f32 %v801_v20, %v293_v41 }
 0x132   :  { %v324_v45 = vmax.f32 %v294_v42, 0.0 }
 0x137   :  { %v295_v43 = vpop.f32.mrf.mxu0 }
 0x138   :  { %v296_v44 = vadd.f32 %v801_v20, %v295_v43 }
 0x13a   :  { %v325_v46 = vmax.f32 %v296_v44, 0.0 }
 0x13c   :  { %v337_v47 = vpack.c.bf16 %v325_v46, %v324_v45 }
 0x13e   :  { %713 = vmatmul.msk.bf16.gmra.mxu1 %vm378_vm6, %v337_v47 }
 0x13f   :  { %v298_v48 = vpop.f32.mrf.mxu0 }
 0x140   :  { %v299_v50 = vadd.f32 %v801_v20, %v298_v48 }
 0x141   :  { %v303_v49 = vpop.f32.mrf.mxu3 }
 0x142   :  { %v326_v54 = vmax.f32 %v299_v50, 0.0  ;;  %v304_v59 = vadd.f32 %v801_v20, %v303_v49 }
 0x144   :  { %v328_v61 = vmax.f32 %v304_v59, 0.0 }
 0x147   :  { %v300_v51 = vpop.f32.mrf.mxu0 }
 0x148   :  { %v301_v52 = vadd.f32 %v801_v20, %v300_v51 }
 0x149   :  { %v305_v53 = vpop.f32.mrf.mxu3 }
 0x14a   :  { %v327_v55 = vmax.f32 %v301_v52, 0.0  ;;  %v306_v58 = vadd.f32 %v801_v20, %v305_v53 }
 0x14c   :  { %v338_v56 = vpack.c.bf16 %v327_v55, %v326_v54  ;;  %v329_v60 = vmax.f32 %v306_v58, 0.0 }
 0x14e   :  { %714 = vmatmul.msk.bf16.vlgmr.msra.gmra.mxu2 %vm378_vm6, %v338_v56  ;;  %v339_v62 = vpack.c.bf16 %v329_v60, %v328_v61 }
 0x151   :  { %v308_v57 = vpop.f32.mrf.mxu3 }
 0x152   :  { %v309_v1 = vadd.f32 %v801_v20, %v308_v57 }
 0x154   :  { %v330_v4 = vmax.f32 %v309_v1, 0.0 }
 0x159   :  { %v310_v63 = vpop.f32.mrf.mxu3 }
 0x15a   :  { %v311_v0 = vadd.f32 %v801_v20, %v310_v63 }
 0x15c   :  { %v331_v3 = vmax.f32 %v311_v0, 0.0 }
 0x15e   :  { %715 = vmatmul.msk.bf16.gmra.mxu2 %vm378_vm6, %v339_v62  ;;  %v340_v5 = vpack.c.bf16 %v331_v3, %v330_v4 }
 0x161   :  { %v313_v2 = vpop.f32.mrf.mxu3 }
 0x162   :  { %v314_v8 = vadd.f32 %v801_v20, %v313_v2 }
 0x164   :  { %v332_v10 = vmax.f32 %v314_v8, 0.0 }
 0x169   :  { %v315_v6 = vpop.f32.mrf.mxu3 }
 0x16a   :  { %v316_v7 = vadd.f32 %v801_v20, %v315_v6 }
 0x16c   :  { %v333_v9 = vmax.f32 %v316_v7, 0.0 }
 0x16e   :  { %716 = vmatmul.msk.bf16.gmra.mxu2 %vm378_vm6, %v340_v5  ;;  %v341_v11 = vpack.c.bf16 %v333_v9, %v332_v10 }
 0x17e   :  { %717 = vmatmul.msk.bf16.gmra.mxu2 %vm378_vm6, %v341_v11 }
 0x18b   :  { %v412_v13 = vpop.f32.mrf.mxu1 }
 0x18c   :  { %v413_v14 = vadd.f32 %v802_v12, %v412_v13 }
 0x18e   :  { %452 = vmax.xlane.f32.xlu2 %v413_v14 }
 0x193   :  { %v414_v15 = vpop.f32.mrf.mxu1 }
 0x194   :  { %v415_v16 = vadd.f32 %v802_v12, %v414_v15 }
 0x196   :  { %454 = vmax.xlane.f32.xlu0 %v415_v16 }
 0x19b   :  { %v417_v17 = vpop.f32.mrf.mxu1 }
 0x19c   :  { %v418_v18 = vadd.f32 %v802_v12, %v417_v17 }
 0x19e   :  { %456 = vmax.xlane.f32.xlu1 %v418_v18 }
 0x1a3   :  { %v419_v19 = vpop.f32.mrf.mxu1 }
 0x1a4   :  { %v420_v20 = vadd.f32 %v802_v12, %v419_v19 }
 0x1a6   :  { %458 = vmax.xlane.f32.xlu2 %v420_v20 }
 0x1ab   :  { %v422_v21 = vpop.f32.mrf.mxu1 }
 0x1ac   :  { %v423_v22 = vadd.f32 %v802_v12, %v422_v21 }
 0x1ae   :  { %460 = vmax.xlane.f32.xlu2 %v423_v22 }
 0x1b3   :  { %v424_v23 = vpop.f32.mrf.mxu1 }
 0x1b4   :  { %v425_v24 = vadd.f32 %v802_v12, %v424_v23 }
 0x1b6   :  { %462 = vmax.xlane.f32.xlu0 %v425_v24 }
 0x1bb   :  { %v427_v25 = vpop.f32.mrf.mxu1 }
 0x1bc   :  { %v1076_v26 = vadd.f32 %v802_v12, %v427_v25 }
 0x1be   :  { %464 = vmax.xlane.f32.xlu1 %v1076_v26 }
 0x1c3   :  { %v429_v27 = vpop.f32.mrf.mxu1 }
 0x1c4   :  { %v1079_v28 = vadd.f32 %v802_v12, %v429_v27 }
 0x1c6   :  { %466 = vmax.xlane.f32.xlu2 %v1079_v28 }
 0x1d1   :  { %v432_v29 = vpop.f32.mrf.mxu2 }
 0x1d2   :  { %v1082_v30 = vadd.f32 %v802_v12, %v432_v29 }
 0x1d4   :  { %468 = vmax.xlane.f32.xlu0 %v1082_v30 }
 0x1d9   :  { %v434_v31 = vpop.f32.mrf.mxu2 }
 0x1da   :  { %v1085_v32 = vadd.f32 %v802_v12, %v434_v31 }
 0x1dc   :  { %470 = vmax.xlane.f32.xlu1 %v1085_v32 }
 0x1e1   :  { %v437_v33 = vpop.f32.mrf.mxu2 }
 0x1e2   :  { %v1088_v34 = vadd.f32 %v802_v12, %v437_v33 }
 0x1e4   :  { %472 = vmax.xlane.f32.xlu2 %v1088_v34 }
 0x1e9   :  { %v439_v35 = vpop.f32.mrf.mxu2 }
 0x1ea   :  { %v1091_v36 = vadd.f32 %v802_v12, %v439_v35 }
 0x1ec   :  { %474 = vmax.xlane.f32.xlu0 %v1091_v36 }
 0x1f1   :  { %v442_v37 = vpop.f32.mrf.mxu2 }
 0x1f2   :  { %v1094_v38 = vadd.f32 %v802_v12, %v442_v37 }
 0x1f4   :  { %476 = vmax.xlane.f32.xlu1 %v1094_v38 }
 0x1f9   :  { %v444_v39 = vpop.f32.mrf.mxu2 }
 0x1fa   :  { %v1097_v40 = vadd.f32 %v802_v12, %v444_v39 }
 0x1fc   :  { %478 = vmax.xlane.f32.xlu2 %v1097_v40 }
 0x201   :  { %v453_v41 = vpop.xlane.xlu2 %452  ;;  %v447_v42 = vpop.f32.mrf.mxu2 }
 0x202   :  { %v1100_v43 = vsub.f32 %v413_v14, %v453_v41  ;;  %v1102_v44 = vadd.f32 %v802_v12, %v447_v42 }
 0x204   :  { %v500_v45 = vmul.f32 1.442695, %v1100_v43  ;;  %480 = vmax.xlane.f32.xlu0 %v1102_v44 }
 0x206   :  { %803 = vpow2.f32 %v500_v45 }
 0x209   :  { %v449_v46 = vpop.f32.mrf.mxu2  ;;  %v455_v47 = vpop.xlane.xlu0 %454 }
 0x20a   :  { %v1106_v48 = vadd.f32 %v802_v12, %v449_v46  ;;  %v1108_v49 = vsub.f32 %v415_v16, %v455_v47 }
 0x20c   :  { %v804_v50 = vpop.eup %803  ;;  %v502_v51 = vmul.f32 1.442695, %v1108_v49  ;;  %482 = vmax.xlane.f32.xlu1 %v1106_v48 }
 0x20d   :  { %532 = vadd.xlane.f32.xlu2 %v804_v50 }
 0x20e   :  { %805 = vpow2.f32 %v502_v51 }
 0x211   :  { %v457_v52 = vpop.xlane.xlu1 %456 }
 0x212   :  { %v1112_v53 = vsub.f32 %v418_v18, %v457_v52 }
 0x214   :  { %v806_v54 = vpop.eup %805  ;;  %v504_v55 = vmul.f32 1.442695, %v1112_v53 }
 0x215   :  { %534 = vadd.xlane.f32.xlu0 %v806_v54 }
 0x216   :  { %807 = vpow2.f32 %v504_v55 }
 0x219   :  { %v459_v56 = vpop.xlane.xlu2 %458 }
 0x21a   :  { %v1115_v57 = vsub.f32 %v420_v20, %v459_v56 }
 0x21c   :  { %v808_v58 = vpop.eup %807  ;;  %v506_v59 = vmul.f32 1.442695, %v1115_v57 }
 0x21d   :  { %536 = vadd.xlane.f32.xlu1 %v808_v58 }
 0x21e   :  { %809 = vpow2.f32 %v506_v59 }
 0x221   :  { %v461_v60 = vpop.xlane.xlu2 %460 }
 0x222   :  { %v1118_v61 = vsub.f32 %v423_v22, %v461_v60 }
 0x224   :  { %v810_v62 = vpop.eup %809  ;;  %v508_v63 = vmul.f32 1.442695, %v1118_v61 }
 0x225   :  { %538 = vadd.xlane.f32.xlu2 %v810_v62 }
 0x226   :  { %811 = vpow2.f32 %v508_v63 }
 0x229   :  { %v463_v0 = vpop.xlane.xlu0 %462 }
 0x22a   :  { %v1121_v1 = vsub.f32 %v425_v24, %v463_v0 }
 0x22c   :  { %v812_v2 = vpop.eup %811  ;;  %v510_v3 = vmul.f32 1.442695, %v1121_v1 }
 0x22d   :  { %540 = vadd.xlane.f32.xlu0 %v812_v2 }
 0x22e   :  { %813 = vpow2.f32 %v510_v3 }
 0x231   :  { %v465_v4 = vpop.xlane.xlu1 %464 }
 0x232   :  { %v1125_v5 = vsub.f32 %v1076_v26, %v465_v4 }
 0x234   :  { %v814_v6 = vpop.eup %813  ;;  %v512_v7 = vmul.f32 1.442695, %v1125_v5 }
 0x235   :  { %542 = vadd.xlane.f32.xlu1 %v814_v6 }
 0x236   :  { %815 = vpow2.f32 %v512_v7 }
 0x239   :  { %v467_v8 = vpop.xlane.xlu2 %466 }
 0x23a   :  { %v1129_v9 = vsub.f32 %v1079_v28, %v467_v8 }
 0x23c   :  { %v816_v10 = vpop.eup %815  ;;  %v514_v11 = vmul.f32 1.442695, %v1129_v9 }
 0x23d   :  { %544 = vadd.xlane.f32.xlu2 %v816_v10 }
 0x23e   :  { %817 = vpow2.f32 %v514_v11 }
 0x244   :  { %v818_v12 = vpop.eup %817 }
 0x245   :  { %546 = vadd.xlane.f32.xlu0 %v818_v12 }
 0x247   :  { %v469_v13 = vpop.xlane.xlu0 %468 }
 0x248   :  { %v1133_v14 = vsub.f32 %v1082_v30, %v469_v13 }
 0x24a   :  { %v516_v15 = vmul.f32 1.442695, %v1133_v14 }
 0x24c   :  { %819 = vpow2.f32 %v516_v15 }
 0x24f   :  { %v471_v16 = vpop.xlane.xlu1 %470 }
 0x250   :  { %v1137_v17 = vsub.f32 %v1085_v32, %v471_v16 }
 0x252   :  { %v820_v18 = vpop.eup %819  ;;  %v518_v19 = vmul.f32 1.442695, %v1137_v17 }
 0x253   :  { %548 = vadd.xlane.f32.xlu1 %v820_v18 }
 0x254   :  { %821 = vpow2.f32 %v518_v19 }
 0x257   :  { %v473_v20 = vpop.xlane.xlu2 %472 }
 0x258   :  { %v1141_v21 = vsub.f32 %v1088_v34, %v473_v20 }
 0x25a   :  { %v822_v22 = vpop.eup %821  ;;  %v520_v23 = vmul.f32 1.442695, %v1141_v21 }
 0x25b   :  { %550 = vadd.xlane.f32.xlu2 %v822_v22 }
 0x25c   :  { %823 = vpow2.f32 %v520_v23 }
 0x25f   :  { %v475_v24 = vpop.xlane.xlu0 %474 }
 0x260   :  { %v1145_v25 = vsub.f32 %v1091_v36, %v475_v24 }
 0x262   :  { %v824_v26 = vpop.eup %823  ;;  %v522_v27 = vmul.f32 1.442695, %v1145_v25 }
 0x263   :  { %552 = vadd.xlane.f32.xlu0 %v824_v26 }
 0x264   :  { %825 = vpow2.f32 %v522_v27 }
 0x267   :  { %v477_v28 = vpop.xlane.xlu1 %476 }
 0x268   :  { %v1149_v29 = vsub.f32 %v1094_v38, %v477_v28 }
 0x26a   :  { %v826_v30 = vpop.eup %825  ;;  %v524_v31 = vmul.f32 1.442695, %v1149_v29 }
 0x26b   :  { %554 = vadd.xlane.f32.xlu1 %v826_v30 }
 0x26c   :  { %827 = vpow2.f32 %v524_v31 }
 0x26f   :  { %v479_v32 = vpop.xlane.xlu2 %478 }
 0x270   :  { %v1153_v33 = vsub.f32 %v1097_v40, %v479_v32 }
 0x272   :  { %v828_v34 = vpop.eup %827  ;;  %v526_v35 = vmul.f32 1.442695, %v1153_v33 }
 0x273   :  { %556 = vadd.xlane.f32.xlu2 %v828_v34 }
 0x274   :  { %829 = vpow2.f32 %v526_v35 }
 0x277   :  { %v481_v36 = vpop.xlane.xlu0 %480 }
 0x278   :  { %v1157_v37 = vsub.f32 %v1102_v44, %v481_v36 }
 0x27a   :  { %v830_v38 = vpop.eup %829  ;;  %v528_v39 = vmul.f32 1.442695, %v1157_v37 }
 0x27b   :  { %558 = vadd.xlane.f32.xlu0 %v830_v38 }
 0x27c   :  { %831 = vpow2.f32 %v528_v39 }
 0x27f   :  { %v483_v41 = vpop.xlane.xlu1 %482 }
 0x280   :  { %v1161_v42 = vsub.f32 %v1106_v48, %v483_v41  ;;  %v533_v46 = vpop.xlane.xlu2 %532 }
 0x282   :  { %v832_v40 = vpop.eup %831  ;;  %v530_v45 = vmul.f32 1.442695, %v1161_v42 }
 0x283   :  { %560 = vadd.xlane.f32.xlu1 %v832_v40 }
 0x284   :  { %833 = vpow2.f32 %v530_v45 }
 0x285   :  { %835 = vlog2.f32 %v533_v46 }
 0x288   :  { %v535_v47 = vpop.xlane.xlu0 %534 }
 0x289   :  { %837 = vlog2.f32 %v535_v47 }
 0x28a   :  { %v834_v44 = vpop.eup %833 }
 0x28b   :  { %v836_v50 = vpop.eup %835  ;;  %562 = vadd.xlane.f32.xlu2 %v834_v44 }
 0x28c   :  { %v565_v51 = vmul.f32 0.6931472, %v836_v50 }
 0x28e   :  { %v596_v55 = vsub.f32 %v1100_v43, %v565_v51 }
 0x28f   :  { %v838_v52 = vpop.eup %837 }
 0x290   :  { %v567_v54 = vmul.f32 0.6931472, %v838_v52  ;;  %v537_v56 = vpop.xlane.xlu1 %536 }
 0x291   :  { %839 = vlog2.f32 %v537_v56 }
 0x292   :  { %v597_v48 = vsub.f32 %v1108_v49, %v567_v54 }
 0x294   :  { %v727_v58 = vpack.c.bf16 %v597_v48, %v596_v55 }
 0x296   :  { %728 = vst [vmem:[#allocation2] sm:$0xff] %v727_v58  }
 0x297   :  { %v840_v60 = vpop.eup %839 }
 0x298   :  { %v539_v59 = vpop.xlane.xlu2 %538  ;;  %v569_v62 = vmul.f32 0.6931472, %v840_v60 }
 0x299   :  { %841 = vlog2.f32 %v539_v59 }
 0x29a   :  { %v598_v2 = vsub.f32 %v1112_v53, %v569_v62 }
 0x29f   :  { %v842_v63 = vpop.eup %841 }
 0x2a0   :  { %v571_v0 = vmul.f32 0.6931472, %v842_v63  ;;  %v541_v4 = vpop.xlane.xlu0 %540 }
 0x2a1   :  { %843 = vlog2.f32 %v541_v4 }
 0x2a2   :  { %v599_v3 = vsub.f32 %v1115_v57, %v571_v0 }
 0x2a4   :  { %v732_v6 = vpack.c.bf16 %v599_v3, %v598_v2 }
 0x2a6   :  { %764 = vst [vmem:[#allocation2 + $0x8] sm:$0xff] %v732_v6  }
 0x2a7   :  { %v844_v49 = vpop.eup %843 }
 0x2a8   :  { %v543_v43 = vpop.xlane.xlu1 %542  ;;  %v573_v7 = vmul.f32 0.6931472, %v844_v49 }
 0x2a9   :  { %845 = vlog2.f32 %v543_v43 }
 0x2aa   :  { %v600_v11 = vsub.f32 %v1118_v61, %v573_v7 }
 0x2af   :  { %v846_v8 = vpop.eup %845 }
 0x2b0   :  { %v575_v10 = vmul.f32 0.6931472, %v846_v8  ;;  %v545_v13 = vpop.xlane.xlu2 %544 }
 0x2b1   :  { %847 = vlog2.f32 %v545_v13 }
 0x2b2   :  { %v601_v12 = vsub.f32 %v1121_v1, %v575_v10 }
 0x2b4   :  { %v737_v15 = vpack.c.bf16 %v601_v12, %v600_v11 }
 0x2b6   :  { %765 = vst [vmem:[#allocation2 + $0x10] sm:$0xff] %v737_v15  }
 0x2b7   :  { %v848_v57 = vpop.eup %847 }
 0x2b8   :  { %v547_v53 = vpop.xlane.xlu0 %546  ;;  %v577_v16 = vmul.f32 0.6931472, %v848_v57 }
 0x2b9   :  { %849 = vlog2.f32 %v547_v53 }
 0x2ba   :  { %v602_v20 = vsub.f32 %v1125_v5, %v577_v16 }
 0x2bf   :  { %v850_v18 = vpop.eup %849 }
 0x2c0   :  { %v579_v19 = vmul.f32 0.6931472, %v850_v18 }
 0x2c2   :  { %v603_v22 = vsub.f32 %v1129_v9, %v579_v19 }
 0x2c4   :  { %v742_v23 = vpack.c.bf16 %v603_v22, %v602_v20 }
 0x2c6   :  { %766 = vst [vmem:[#allocation2 + $0x18] sm:$0xff] %v742_v23   ;;  %v549_v24 = vpop.xlane.xlu1 %548 }
 0x2c7   :  { %851 = vlog2.f32 %v549_v24 }
 0x2cd   :  { %v852_v1 = vpop.eup %851 }
 0x2ce   :  { %v551_v61 = vpop.xlane.xlu2 %550  ;;  %v581_v26 = vmul.f32 0.6931472, %v852_v1 }
 0x2cf   :  { %853 = vlog2.f32 %v551_v61 }
 0x2d0   :  { %v604_v30 = vsub.f32 %v1133_v14, %v581_v26 }
 0x2d5   :  { %v854_v27 = vpop.eup %853 }
 0x2d6   :  { %v583_v28 = vmul.f32 0.6931472, %v854_v27  ;;  %v553_v32 = vpop.xlane.xlu0 %552 }
 0x2d7   :  { %855 = vlog2.f32 %v553_v32 }
 0x2d8   :  { %v605_v31 = vsub.f32 %v1137_v17, %v583_v28 }
 0x2da   :  { %v747_v34 = vpack.c.bf16 %v605_v31, %v604_v30 }
 0x2dc   :  { %767 = vst [vmem:[#allocation2 + $0x20] sm:$0xff] %v747_v34  }
 0x2dd   :  { %v856_v9 = vpop.eup %855 }
 0x2de   :  { %v555_v5 = vpop.xlane.xlu1 %554  ;;  %v585_v35 = vmul.f32 0.6931472, %v856_v9 }
 0x2df   :  { %857 = vlog2.f32 %v555_v5 }
 0x2e0   :  { %v606_v39 = vsub.f32 %v1141_v21, %v585_v35 }
 0x2e5   :  { %v858_v36 = vpop.eup %857 }
 0x2e6   :  { %v587_v38 = vmul.f32 0.6931472, %v858_v36  ;;  %v557_v40 = vpop.xlane.xlu2 %556 }
 0x2e7   :  { %859 = vlog2.f32 %v557_v40 }
 0x2e8   :  { %v607_v41 = vsub.f32 %v1145_v25, %v587_v38 }
 0x2ea   :  { %v752_v45 = vpack.c.bf16 %v607_v41, %v606_v39 }
 0x2ec   :  { %768 = vst [vmem:[#allocation2 + $0x28] sm:$0xff] %v752_v45  }
 0x2ed   :  { %v860_v17 = vpop.eup %859 }
 0x2ee   :  { %v559_v14 = vpop.xlane.xlu0 %558  ;;  %v589_v46 = vmul.f32 0.6931472, %v860_v17 }
 0x2ef   :  { %861 = vlog2.f32 %v559_v14 }
 0x2f0   :  { %v608_v50 = vsub.f32 %v1149_v29, %v589_v46 }
 0x2f5   :  { %v862_v47 = vpop.eup %861 }
 0x2f6   :  { %v591_v44 = vmul.f32 0.6931472, %v862_v47  ;;  %v561_v52 = vpop.xlane.xlu1 %560 }
 0x2f7   :  { %863 = vlog2.f32 %v561_v52 }
 0x2f8   :  { %v609_v51 = vsub.f32 %v1153_v33, %v591_v44 }
 0x2fa   :  { %v757_v54 = vpack.c.bf16 %v609_v51, %v608_v50 }
 0x2fc   :  { %769 = vst [vmem:[#allocation2 + $0x30] sm:$0xff] %v757_v54  }
 0x2fd   :  { %v864_v25 = vpop.eup %863 }
 0x2fe   :  { %v563_v21 = vpop.xlane.xlu2 %562  ;;  %v593_v55 = vmul.f32 0.6931472, %v864_v25 }
 0x2ff   :  { %865 = vlog2.f32 %v563_v21 }
 0x300   :  { %v610_v29 = vsub.f32 %v1157_v37, %v593_v55 }
 0x305   :  { %v866_v48 = vpop.eup %865 }
 0x306   :  { %v595_v56 = vmul.f32 0.6931472, %v866_v48 }
 0x308   :  { %v611_v33 = vsub.f32 %v1161_v42, %v595_v56 }
 0x30a   :  { %v762_v58 = vpack.c.bf16 %v611_v33, %v610_v29 }
 0x30c   :  { %770 = vst [vmem:[#allocation2 + $0x38] sm:$0xff] %v762_v58  }
 0x30d   :  { %656 = dma.vmem_to_hbm [thread:$0]  %s649_s12, 1024, %s651_s15, [#allocation3], %s897_s16, %s897_s16, %s898_s17  }
 0x30e   :  { %891 = dma.done.wait [#allocation3], 1024  }
 0x30f   :  { %892 = vsyncadd [#allocation3], 4294966272 }
 0x310   :  { %661 = vsyncpa [#allocation3], 1 }

</bundles_post_ra>
